<compile_context>
chip_gen: v7x
topology: tpu7x:2x2x1
jax: 0.10.0
libtpu: 0.0.40
codegen_flags: <defaults>
</compile_context>

<pallas_src>
import functools

import jax
import jax.numpy as jnp
from jax.experimental import pallas as pl
from jax.experimental.pallas import tpu as pltpu


def _reward_criterion_kernel(inp_ref, seq_ref, rew_ref, out_ref,
                             num_acc, den_acc, *, total_rows, block_rows):
    i = pl.program_id(0)

    @pl.when(i == 0)
    def _init():
        num_acc[...] = jnp.zeros_like(num_acc)
        den_acc[...] = jnp.zeros_like(den_acc)

    inp = inp_ref[...].astype(jnp.float32)
    rew = rew_ref[...].astype(jnp.float32)
    seq = seq_ref[...]

    # mask = (seq > 0), shifted right by one along T, column 0 forced to 1.
    tok = (seq > 0).astype(jnp.float32)
    shifted = pltpu.roll(tok, shift=1, axis=1)          # lane-axis rotate (XLU)
    col = jax.lax.broadcasted_iota(jnp.int32, tok.shape, dimension=1)
    m = jnp.where(col == 0, jnp.float32(1.0), shifted)  # wrap-around overwritten

    # Zero out rows past the logical batch (last, possibly partial, tile).
    row = i * block_rows + jax.lax.broadcasted_iota(jnp.int32, tok.shape, dimension=0)
    valid = row < total_rows
    m = jnp.where(valid, m, jnp.float32(0.0))

    # Fused per-tile partial sums; guard padded rows against garbage (NaN/Inf).
    prod = jnp.where(valid, inp * rew * m, jnp.float32(0.0))
    num_acc[...] += jnp.sum(prod, keepdims=True)        # (1, 1)
    den_acc[...] += jnp.sum(m, keepdims=True)           # (1, 1)

    # Negate once and store the scalar output a single time, in the finalize step.
    @pl.when(i == pl.num_programs(0) - 1)
    def _finalize():
        out_ref[...] = -(num_acc[...] / den_acc[...])


def reward_criterion(inp, seq, reward, *, block_rows=None):
    """inp: (B,T) log-probs, seq: (B,T) token ids (any int dtype), reward: (B,T).

    Returns the scalar self-critical loss (f32)."""
    B, T = inp.shape
    assert seq.shape == (B, T) and reward.shape == (B, T)

    if block_rows is None:
        # ~4 MiB of f32 per input per tile; 3 inputs x 2 pipeline buffers
        # ~= 24 MiB, inside the 48 MiB vmem limit requested below on all chips.
        block_rows = max(8, ((4 * 1024 * 1024) // (4 * max(T, 1))) // 8 * 8)

    # Tile rows in multiples of 8 (f32 sublane); a whole-array block is always OK.
    TB = B if block_rows >= B else max(8, (block_rows // 8) * 8)
    G = pl.cdiv(B, TB)

    kernel = functools.partial(
        _reward_criterion_kernel, total_rows=B, block_rows=TB)

    out = pl.pallas_call(
        kernel,
        out_shape=jax.ShapeDtypeStruct((1, 1), jnp.float32),
        grid=(G,),
        in_specs=[
            pl.BlockSpec((TB, T), lambda i: (i, 0)),   # input (log-probs)
            pl.BlockSpec((TB, T), lambda i: (i, 0)),   # seq (token ids)
            pl.BlockSpec((TB, T), lambda i: (i, 0)),   # reward
        ],
        out_specs=pl.BlockSpec((1, 1), lambda i: (0, 0)),
        scratch_shapes=[
            pltpu.VMEM((1, 1), jnp.float32),           # numerator accumulator
            pltpu.VMEM((1, 1), jnp.float32),           # denominator accumulator
        ],
        compiler_params=pltpu.CompilerParams(
            dimension_semantics=("arbitrary",),        # accumulator axis
            vmem_limit_bytes=48 * 1024 * 1024),
    )(inp, seq, reward)
    return out[0, 0]


def _reference(inp, seq, reward):
    # Pure-JAX mirror of the PyTorch forward.
    B, _ = inp.shape
    mask = (seq > 0).astype(jnp.float32)
    mask = jnp.concatenate([jnp.ones((B, 1), jnp.float32), mask[:, :-1]], axis=1)
    return jnp.sum(-inp * reward * mask) / jnp.sum(mask)


if __name__ == "__main__":
    key = jax.random.PRNGKey(0)

    cases = [
        dict(B=24, T=128, block_rows=8),     # multi-step grid, exact tiling
        dict(B=20, T=128, block_rows=8),     # multi-step grid, ragged last tile
        dict(B=4,  T=128, block_rows=None),  # single whole-array block
        dict(B=16, T=256, block_rows=None),  # multi-vreg lane width, single block
    ]
    for c in cases:
        B, T = c["B"], c["T"]
        k1, k2, k3, key = jax.random.split(key, 4)
        inp = jax.random.normal(k1, (B, T), dtype=jnp.float32)       # log-probs
        seq = jax.random.randint(k2, (B, T), 0, 5, dtype=jnp.int32)  # token ids (0 = pad)
        reward = jax.random.normal(k3, (B, T), dtype=jnp.float32)    # per-token advantage

        out = jax.block_until_ready(
            reward_criterion(inp, seq, reward, block_rows=c["block_rows"]))
        ref = _reference(inp, seq, reward)
        assert jnp.allclose(out, ref, atol=1e-5, rtol=1e-5), (c, float(out), float(ref))

    print("KERNEL_OK")
</pallas_src>

<mosaic_0001>
module attributes {stable_mosaic.version = 11 : i64} {
  func.func @_reward_criterion_kernel(%arg0: i32, %arg1: memref<8x128xf32, #tpu.memory_space<vmem>>, %arg2: memref<8x128xi32, #tpu.memory_space<vmem>>, %arg3: memref<8x128xf32, #tpu.memory_space<vmem>>, %arg4: memref<1x1xf32, #tpu.memory_space<vmem>>, %arg5: memref<1x1xf32, #tpu.memory_space<vmem>>, %arg6: memref<1x1xf32, #tpu.memory_space<vmem>>) attributes {dimension_semantics = [#tpu.dimension_semantics<arbitrary>], iteration_bounds = array<i64: 3>, scalar_prefetch = 0 : i64, scratch_operands = 2 : i64, tpu.core_type = #tpu.core_type<tc>, window_params = [{transform_indices = @transform_0, window_bounds = array<i64: 8, 128>}, {transform_indices = @transform_1, window_bounds = array<i64: 8, 128>}, {transform_indices = @transform_2, window_bounds = array<i64: 8, 128>}, {pipeline_mode = #tpu.pipeline_mode<synchronous>, transform_indices = @transform_3, window_bounds = array<i64: 1, 1>}]} {
    %c0_i32 = arith.constant 0 : i32
    %0 = arith.cmpi eq, %arg0, %c0_i32 : i32
    %1 = arith.extui %0 : i1 to i32
    %c0_i32_0 = arith.constant 0 : i32
    %2 = arith.cmpi ne, %1, %c0_i32_0 : i32
    scf.if %2 {
      %cst_21 = arith.constant 0.000000e+00 : f32
      %47 = vector.broadcast %cst_21 : f32 to vector<1x1xf32>
      %c0_22 = arith.constant 0 : index
      %c0_23 = arith.constant 0 : index
      %48 = vector.load %arg5[%c0_22, %c0_23] : memref<1x1xf32, #tpu.memory_space<vmem>>, vector<1x1xf32>
      tpu.vector_store %arg5[%c0_22, %c0_23], %47 {strides = array<i32>} : memref<1x1xf32, #tpu.memory_space<vmem>>, vector<1x1xf32>,
      %cst_24 = arith.constant 0.000000e+00 : f32
      %49 = vector.broadcast %cst_24 : f32 to vector<1x1xf32>
      %c0_25 = arith.constant 0 : index
      %c0_26 = arith.constant 0 : index
      %50 = vector.load %arg6[%c0_25, %c0_26] : memref<1x1xf32, #tpu.memory_space<vmem>>, vector<1x1xf32>
      tpu.vector_store %arg6[%c0_25, %c0_26], %49 {strides = array<i32>} : memref<1x1xf32, #tpu.memory_space<vmem>>, vector<1x1xf32>,
    } else {
    }
    %c0 = arith.constant 0 : index
    %c0_1 = arith.constant 0 : index
    %3 = vector.load %arg1[%c0, %c0_1] : memref<8x128xf32, #tpu.memory_space<vmem>>, vector<8x128xf32>
    %c0_2 = arith.constant 0 : index
    %c0_3 = arith.constant 0 : index
    %4 = vector.load %arg3[%c0_2, %c0_3] : memref<8x128xf32, #tpu.memory_space<vmem>>, vector<8x128xf32>
    %c0_4 = arith.constant 0 : index
    %c0_5 = arith.constant 0 : index
    %5 = vector.load %arg2[%c0_4, %c0_5] : memref<8x128xi32, #tpu.memory_space<vmem>>, vector<8x128xi32>
    %c0_i32_6 = arith.constant 0 : i32
    %6 = vector.broadcast %c0_i32_6 : i32 to vector<8x128xi32>
    %7 = arith.cmpi sgt, %5, %6 : vector<8x128xi32>
    %8 = arith.extui %7 : vector<8x128xi1> to vector<8x128xi32>
    %9 = arith.sitofp %8 : vector<8x128xi32> to vector<8x128xf32>
    %c1_i32 = arith.constant 1 : i32
    %10 = tpu.dynamic_rotate %9 by %c1_i32 dim 1 : vector<8x128xf32>, i32 -> vector<8x128xf32>
    %11 = tpu.iota {dimensions = array<i32: 1>} : vector<8x128xi32>
    %c0_i32_7 = arith.constant 0 : i32
    %12 = vector.broadcast %c0_i32_7 : i32 to vector<8x128xi32>
    %13 = arith.cmpi eq, %11, %12 : vector<8x128xi32>
    %cst = arith.constant 1.000000e+00 : f32
    %14 = vector.broadcast %cst : f32 to vector<8x128xf32>
    %15 = arith.select %13, %14, %10 : vector<8x128xi1>, vector<8x128xf32>
    %c8_i32 = arith.constant 8 : i32
    %16 = arith.muli %arg0, %c8_i32 : i32
    %17 = tpu.iota {dimensions = array<i32: 0>} : vector<8x128xi32>
    %18 = vector.broadcast %16 : i32 to vector<8x128xi32>
    %19 = arith.addi %18, %17 : vector<8x128xi32>
    %c24_i32 = arith.constant 24 : i32
    %20 = vector.broadcast %c24_i32 : i32 to vector<8x128xi32>
    %21 = arith.cmpi slt, %19, %20 : vector<8x128xi32>
    %cst_8 = arith.constant 0.000000e+00 : f32
    %22 = vector.broadcast %cst_8 : f32 to vector<8x128xf32>
    %23 = arith.select %21, %15, %22 : vector<8x128xi1>, vector<8x128xf32>
    %24 = arith.mulf %3, %4 : vector<8x128xf32>
    %25 = arith.mulf %24, %23 : vector<8x128xf32>
    %cst_9 = arith.constant 0.000000e+00 : f32
    %26 = vector.broadcast %cst_9 : f32 to vector<8x128xf32>
    %27 = arith.select %21, %25, %26 : vector<8x128xi1>, vector<8x128xf32>
    %c0_10 = arith.constant 0 : index
    %c0_11 = arith.constant 0 : index
    %28 = vector.load %arg5[%c0_10, %c0_11] : memref<1x1xf32, #tpu.memory_space<vmem>>, vector<1x1xf32>
    %29 = vector.shape_cast %27 : vector<8x128xf32> to vector<1x8x128xf32>
    %cst_12 = arith.constant dense<0.000000e+00> : vector<1xf32>
    %30 = vector.multi_reduction <add>, %29, %cst_12 [1, 2] : vector<1x8x128xf32> to vector<1xf32>
    %31 = vector.shape_cast %30 : vector<1xf32> to vector<1x1x1xf32>
    %32 = vector.extract %31[0, 0, 0] : f32 from vector<1x1x1xf32>
    %33 = vector.broadcast %32 : f32 to vector<1x1xf32>
    %34 = arith.addf %28, %33 : vector<1x1xf32>
    %c0_13 = arith.constant 0 : index
    %c0_14 = arith.constant 0 : index
    %35 = vector.load %arg5[%c0_13, %c0_14] : memref<1x1xf32, #tpu.memory_space<vmem>>, vector<1x1xf32>
    tpu.vector_store %arg5[%c0_13, %c0_14], %34 {strides = array<i32>} : memref<1x1xf32, #tpu.memory_space<vmem>>, vector<1x1xf32>,
    %c0_15 = arith.constant 0 : index
    %c0_16 = arith.constant 0 : index
    %36 = vector.load %arg6[%c0_15, %c0_16] : memref<1x1xf32, #tpu.memory_space<vmem>>, vector<1x1xf32>
    %37 = vector.shape_cast %23 : vector<8x128xf32> to vector<1x8x128xf32>
    %cst_17 = arith.constant dense<0.000000e+00> : vector<1xf32>
    %38 = vector.multi_reduction <add>, %37, %cst_17 [1, 2] : vector<1x8x128xf32> to vector<1xf32>
    %39 = vector.shape_cast %38 : vector<1xf32> to vector<1x1x1xf32>
    %40 = vector.extract %39[0, 0, 0] : f32 from vector<1x1x1xf32>
    %41 = vector.broadcast %40 : f32 to vector<1x1xf32>
    %42 = arith.addf %36, %41 : vector<1x1xf32>
    %c0_18 = arith.constant 0 : index
    %c0_19 = arith.constant 0 : index
    %43 = vector.load %arg6[%c0_18, %c0_19] : memref<1x1xf32, #tpu.memory_space<vmem>>, vector<1x1xf32>
    tpu.vector_store %arg6[%c0_18, %c0_19], %42 {strides = array<i32>} : memref<1x1xf32, #tpu.memory_space<vmem>>, vector<1x1xf32>,
    %c2_i32 = arith.constant 2 : i32
    %44 = arith.cmpi eq, %arg0, %c2_i32 : i32
    %45 = arith.extui %44 : i1 to i32
    %c0_i32_20 = arith.constant 0 : i32
    %46 = arith.cmpi ne, %45, %c0_i32_20 : i32
    scf.if %46 {
      %c0_21 = arith.constant 0 : index
      %c0_22 = arith.constant 0 : index
      %47 = vector.load %arg5[%c0_21, %c0_22] : memref<1x1xf32, #tpu.memory_space<vmem>>, vector<1x1xf32>
      %c0_23 = arith.constant 0 : index
      %c0_24 = arith.constant 0 : index
      %48 = vector.load %arg6[%c0_23, %c0_24] : memref<1x1xf32, #tpu.memory_space<vmem>>, vector<1x1xf32>
      %49 = arith.divf %47, %48 : vector<1x1xf32>
      %cst_25 = arith.constant 0.000000e+00 : f32
      %50 = vector.broadcast %cst_25 : f32 to vector<1x1xf32>
      %51 = arith.subf %50, %49 : vector<1x1xf32>
      %c0_26 = arith.constant 0 : index
      %c0_27 = arith.constant 0 : index
      %52 = vector.load %arg4[%c0_26, %c0_27] : memref<1x1xf32, #tpu.memory_space<vmem>>, vector<1x1xf32>
      tpu.vector_store %arg4[%c0_26, %c0_27], %51 {strides = array<i32>} : memref<1x1xf32, #tpu.memory_space<vmem>>, vector<1x1xf32>,
    } else {
    }
    return
  }
  func.func @transform_0(%arg0: i32) -> (i32, i32) {
    %c0_i32 = arith.constant 0 : i32
    %c0_i32_0 = arith.constant 0 : i32
    return %arg0, %c0_i32 : i32, i32
  }
  func.func @transform_1(%arg0: i32) -> (i32, i32) {
    %c0_i32 = arith.constant 0 : i32
    %c0_i32_0 = arith.constant 0 : i32
    return %arg0, %c0_i32 : i32, i32
  }
  func.func @transform_2(%arg0: i32) -> (i32, i32) {
    %c0_i32 = arith.constant 0 : i32
    %c0_i32_0 = arith.constant 0 : i32
    return %arg0, %c0_i32 : i32, i32
  }
  func.func @transform_3(%arg0: i32) -> (i32, i32) {
    %c0_i32 = arith.constant 0 : i32
    %c0_i32_0 = arith.constant 0 : i32
    %c0_i32_1 = arith.constant 0 : i32
    return %c0_i32, %c0_i32_0 : i32, i32
  }
}

</mosaic_0001>

<bundles_post_ra>
// kernel: tpu_custom_call.1
= control target key start
LH: loop header
LB: loop body
LE: loop exit
PB: predicated region body
PF: predicated region fallthrough
CT: control target
= control target key end

     0   :  { %8 = vsyncpa [#allocation5], 0  ;;  %s899_s0 = inlined_call_operand.hbm [shape: f32[24,128], index: 0, kind: input, shape index: {}]   ;;  %s900_s1 = inlined_call_operand.hbm [shape: s32[24,128], index: 1, kind: input, shape index: {}]   ;;  %s901_s2 = inlined_call_operand.hbm [shape: f32[24,128], index: 2, kind: input, shape index: {}]   ;;  %s902_s3 = inlined_call_operand.hbm [shape: f32[1,1], index: 3, kind: output, shape index: {}]  }
   0x1   :  { %10 = vsyncpa [#allocation5 + $0x1], 0 }
   0x2   :  { %11 = vsyncpa [#allocation8], 0 }
   0x3   :  { %13 = vsyncpa [#allocation8 + $0x1], 0 }
   0x4   :  { %14 = vsyncpa [#allocation6], 0  ;;  %s684_s12 = smov 0   ;;  %s686_s13 = smov 0  }
   0x5   :  { %s688_s14 = smov 0   ;;  %s690_s15 = smov 0  }
   0x6 LB: > { %s703_s16 = sadd.s32 4294967295, %s655_s15   ;;  %s706_s17 = sadd.s32 1, %s655_s15   ;;  %s655_s15 = sphi %s690_s15, %s917_s15   ;;  %s651_s14 = sphi %s688_s14, %s916_s14   ;;  %s647_s13 = sphi %s686_s13, %s915_s13   ;;  %s643_s12 = sphi %s684_s12, %s914_s12  }
   0x7   : > { %s24_s18 = ssub.s32 %s655_s15, %s706_s17  ;;  %s27_s19 = sadd.s32 1, %s651_s14 }
   0x8   : > { %p25_p0 = scmp.eq.s32.totalorder %s24_s18, 0  ;;  %p34_p1 = scmp.ne.s32.totalorder %s651_s14, %s647_s13 }
   0x9   : > { %p35_p2 = scmp.eq.s32.totalorder %s655_s15, 0  ;;  %p40_p3 = scmp.ne.s32.totalorder %s647_s13, %s643_s12 }
   0xa   : > { %s716_s20 = scalar_select %p25_p0, %s651_s14, %s27_s19  }
   0xb   : > { %p36_p4 = por %p35_p2, %p34_p1  ;;  %p41_p5 = scmp.eq.s32.totalorder %s703_s16, 0 }
   0xc   : > { %p456_p6 = scmp.lt.s32.totalorder %s655_s15, 3  ;;  %s137_s22 = sand.u32 1, %s651_s14  }
   0xd   : > { %p720_p7 = por %p41_p5, %p40_p3  ;;  %s727_s23 = sshll.u32 %s137_s22, 3 }
   0xe   : > { %s730_s24 = sshll.u32 %s655_s15, 7  ;;  %p732_p8 = pnand %p456_p6, %p36_p4 }
   0xf   : > { %s905_s21 = scalar_select %p720_p7, 1, 0 }
  0x10   : > { %s906_s25 = scalar_select %p732_p8, 1, 0 }
  0x11   : > { %s155_s26 = sand.u32 1, %s655_s15   ;;  %s741_s29 = scalar_lea.hbm %s900_s1, %s730_s24 }
  0x12   : > { %s159_s30 = scalar_lea.vmem [#allocation7], %s727_s23  ;;  %s748_s5 = scalar_lea.sflag [#allocation8], %s155_s26 }
  0x13   : > { %s166_s4 = sshll.u32 %s159_s30, 4  ;;  %s497_s6 = scalar_lea.hbm %s741_s29, 128  ;;  %s745_s4 = int_to_ptr.vmem [resolvable:$true] %s166_s4 }
  0x14   : > { %p498_p11 = scmp.ne.s32.totalorder %s741_s29, %s497_s6  ;;  %p754_p12 = pneg %p732_p8 }
  0x15   : > { %s502_s10 = scalar_lea.hbm %s900_s1, 384  ;;  %p503_p1 = scmp.lt.u32.totalorder %s741_s29, %s900_s1 }
  0x16   : > { %p500_p13 = pnand %p754_p12, %p498_p11  ;;  %p504_p2 = scmp.lt.u32.totalorder %s502_s10, %s497_s6 }
  0x17   : > { %p506_p4 = scmp.lt.u32.totalorder %s497_s6, %s741_s29 }
  0x18   : > { %p501_p0 = pneg %p500_p13  ;;  %p505_p3 = por %p504_p2, %p503_p1 }
  0x1a   : > { %p507_p5 = por %p506_p4, %p505_p3 }
  0x1c   : > { %p508_p6 = pnand %p507_p5, %p501_p0 }
  0x1e   : > { %511 = shalt.err (!%p508_p6)
}
  0x1f   : > { %s512_s18 = scalar_lea.vmem %s745_s4, 128  ;;  %s657_s19 = smov [#allocation7]  }
  0x20   : > { %p513_p11 = scmp.ne.s32.totalorder %s745_s4, %s512_s18  ;;  %s517_s26 = sshll.u32 %s657_s19, 4  ;;  %s518_s26 = int_to_ptr.vmem [resolvable:$false] %s517_s26 }
  0x21   : > { %s519_s27 = scalar_lea.vmem %s518_s26, 256  ;;  %p520_p10 = scmp.lt.s32.totalorder %s745_s4, %s518_s26 }
  0x22   : > { %p515_p13 = pnand %p513_p11, %p754_p12  ;;  %p521_p7 = scmp.lt.s32.totalorder %s519_s27, %s512_s18 }
  0x24   : > { %p516_p9 = pneg %p515_p13  ;;  %p522_p1 = por %p521_p7, %p520_p10 }
  0x26   : > { %p523_p2 = pnand %p522_p1, %p516_p9 }
  0x28   : > { %526 = shalt.err (!%p523_p2)
}
  0x29   : > { %452 = dma.hbm_to_vmem [thread:$0]  (!%p732_p8), %s741_s29, 128, %s745_s4, %s748_s5  }
  0x2a   : > { %p908_p0 = scmp.lt.s32.totalorder %s655_s15, 4  ;;  %p909_p3 = scmp.ge.s32.totalorder %s655_s15, 1 }
  0x2b   : > { %s790_s8 = scalar_lea.hbm %s899_s0, %s730_s24  ;;  %s141_s9 = scalar_lea.vmem [#allocation4], %s727_s23 }
  0x2c   : > { %p782_p4 = pnand %p909_p3, %p908_p0  ;;  %s148_s10 = sshll.u32 %s141_s9, 4  ;;  %s793_s10 = int_to_ptr.vmem [resolvable:$true] %s148_s10 }
  0x2d   : > { %s799_s15 = scalar_lea.hbm %s901_s2, %s730_s24  ;;  %s138_s11 = scalar_lea.sflag [#allocation5], %s137_s22 }
  0x2e   : > { %s910_s28 = scalar_select %p782_p4, 1, 0 }
  0x2f   : > { %s527_s12 = scalar_lea.hbm %s790_s8, 128  ;;  %s532_s26 = scalar_lea.hbm %s899_s0, 384 }
  0x30   : > { %p528_p7 = scmp.ne.s32.totalorder %s790_s8, %s527_s12  ;;  %p533_p5 = scmp.lt.u32.totalorder %s790_s8, %s899_s0 }
  0x31   : > { %p534_p6 = scmp.lt.u32.totalorder %s532_s26, %s527_s12  ;;  %p536_p13 = scmp.lt.u32.totalorder %s527_s12, %s790_s8 }
  0x32   : > { %p530_p9 = pnand %p528_p7, %p754_p12 }
  0x33   : > { %p535_p11 = por %p534_p6, %p533_p5 }
  0x34   : > { %p531_p10 = pneg %p530_p9 }
  0x35   : > { %p537_p1 = por %p536_p13, %p535_p11 }
  0x37   : > { %p538_p2 = pnand %p537_p1, %p531_p10 }
  0x39   : > { %541 = shalt.err (!%p538_p2)
}
  0x3a   : > { %s542_s22 = scalar_lea.vmem %s793_s10, 128  ;;  %s658_s24 = smov [#allocation4]  }
  0x3b   : > { %p543_p0 = scmp.ne.s32.totalorder %s793_s10, %s542_s22  ;;  %s547_s6 = sshll.u32 %s658_s24, 4  ;;  %s548_s6 = int_to_ptr.vmem [resolvable:$false] %s547_s6 }
  0x3c   : > { %s549_s9 = scalar_lea.vmem %s548_s6, 256  ;;  %p550_p9 = scmp.lt.s32.totalorder %s793_s10, %s548_s6 }
  0x3d   : > { %p545_p3 = pnand %p543_p0, %p754_p12  ;;  %p551_p4 = scmp.lt.s32.totalorder %s549_s9, %s542_s22 }
  0x3f   : > { %p546_p7 = pneg %p545_p3  ;;  %p552_p5 = por %p551_p4, %p550_p9 }
  0x41   : > { %p553_p6 = pnand %p552_p5, %p546_p7 }
  0x43   : > { %556 = shalt.err (!%p553_p6)
}
  0x44   : > { %449 = dma.hbm_to_vmem [thread:$0]  (!%p732_p8), %s790_s8, 128, %s793_s10, %s138_s11  }
  0x45   : > { %s177_s29 = scalar_lea.vmem [#allocation9], %s727_s23  ;;  %s557_s12 = scalar_lea.hbm %s799_s15, 128 }
  0x46   : > { %s184_s4 = sshll.u32 %s177_s29, 4  ;;  %p558_p10 = scmp.ne.s32.totalorder %s799_s15, %s557_s12  ;;  %s185_s4 = int_to_ptr.vmem [resolvable:$true] %s184_s4 }
  0x47   : > { %s562_s26 = scalar_lea.hbm %s901_s2, 384  ;;  %p563_p13 = scmp.lt.u32.totalorder %s799_s15, %s901_s2 }
  0x48   : > { %p560_p4 = pnand %p558_p10, %p754_p12  ;;  %p564_p1 = scmp.lt.u32.totalorder %s562_s26, %s557_s12 }
  0x49   : > { %p566_p0 = scmp.lt.u32.totalorder %s557_s12, %s799_s15 }
  0x4a   : > { %p561_p11 = pneg %p560_p4  ;;  %p565_p2 = por %p564_p1, %p563_p13 }
  0x4c   : > { %p567_p3 = por %p566_p0, %p565_p2 }
  0x4e   : > { %p568_p7 = pnand %p567_p3, %p561_p11 }
  0x50   : > { %571 = shalt.err (!%p568_p7)
}
  0x51   : > { %s572_s23 = scalar_lea.vmem %s185_s4, 128  ;;  %s659_s8 = smov [#allocation9]  }
  0x52   : > { %p573_p9 = scmp.ne.s32.totalorder %s185_s4, %s572_s23  ;;  %s577_s10 = sshll.u32 %s659_s8, 4  ;;  %s578_s10 = int_to_ptr.vmem [resolvable:$false] %s577_s10 }
  0x53   : > { %s579_s11 = scalar_lea.vmem %s578_s10, 256  ;;  %p580_p10 = scmp.lt.s32.totalorder %s185_s4, %s578_s10 }
  0x54   : > { %p575_p5 = pnand %p573_p9, %p754_p12  ;;  %p581_p4 = scmp.lt.s32.totalorder %s579_s11, %s572_s23 }
  0x56   : > { %p576_p6 = pneg %p575_p5  ;;  %p582_p8 = por %p581_p4, %p580_p10 }
  0x58   : > { %p583_p1 = pnand %p582_p8, %p576_p6 }
  0x5a   : > { %586 = shalt.err (!%p583_p1)
}
  0x5b   : > { %p911_p13 = scmp.ne.s32.totalorder %s906_s25, 0  ;;  %p912_p11 = scmp.ne.s32.totalorder %s910_s28, 0 }
  0x5c   : > { %s195_s7 = sand.u32 (!%p912_p11), 1, %s647_s13   ;;  %p913_p12 = scmp.ne.s32.totalorder (!%p912_p11), %s905_s21, 0 }
  0x5d   : > { %455 = dma.hbm_to_vmem [thread:$0]  (!%p911_p13), %s799_s15, 128, %s185_s4, %s748_s5  }
  0x5e   : > { %193 = sbr.rel (%p912_p11) target bundleno = 494 (0x1ee), region = 32  ;;  %s846_s22 = sshll.u32 (!%p912_p11), %s195_s7, 3 }
  0x5f   : > { %s196_s24 = scalar_lea.sflag (!%p912_p11), [#allocation5], %s195_s7  ;;  %s199_s6 = scalar_lea.vmem (!%p912_p11), [#allocation4], %s846_s22 }
  0x65   : > { %630 = dma.done.wait (%p913_p12), %s196_s24, 128  }
  0x66   : > { %632 = vsyncadd (%p913_p12), %s196_s24, 4294967168  ;;  %s204_s25 = sand.u32 1, %s703_s16   ;;  %s208_s28 = scalar_lea.vmem [#allocation7], %s846_s22 }
  0x67   : > { %s205_s5 = scalar_lea.sflag [#allocation8], %s204_s25 }
  0x68   : > { %634 = dma.done.wait (%p913_p12), %s205_s5, 256  }
  0x69   : > { %636 = vsyncadd (%p913_p12), %s205_s5, 4294967040  ;;  %s217_s15 = scalar_lea.vmem [#allocation9], %s846_s22  ;;  %p424_p8 = scmp.ne.s32.totalorder %s703_s16, 0 }
  0x6a   : > { %vm249_vm0 = vcmask (!%p424_p8), 0   ;;  %v660_v0 = vmov (!%p424_p8), 0.0  }
  0x6b   : > { %248 = sbr.rel (%p424_p8) target bundleno = 114 (0x72), region = 48  ;;  %250 = vst.msk [vmem:[#allocation2] sm:$0x1] (!%p424_p8), %vm249_vm0, %v660_v0  ;;  %251 = vst.msk [vmem:[#allocation3] sm:$0x1] (!%p424_p8), %vm249_vm0, %v660_v0 }
  0x72 PF: > { %v254_v1 = vld [vmem:[%s208_s28] sm:$0xff]  ;;  %v661_v2 = vmov 0.0   ;;  %s662_s9 = smov 1   ;;  %v260_v4 = vlaneseq  ;;  %s426_s21 = sshll.u32 %s703_s16, 3  ;;  %v252_v9 = vld [vmem:[%s199_s6] sm:$0xff]  ;;  %vm286_vm4 = vcmask 0  }
  0x73   : > { %vm255_vm1 = vcmp.gt.s32.totalorder %v254_v1, 0  ;;  %v267_v6 = vstv %s426_s21  ;;  %v253_v10 = vld [vmem:[%s217_s15] sm:$0xff]  ;;  %v274_v31 = vld [vmem:[#allocation2] sm:$0x1]  ;;  %v288_v32 = vld [vmem:[#allocation3] sm:$0x1] }
  0x74   : > { %v425_v3 = vsel %vm255_vm1, 1.0, %v661_v2  ;;  %v266_v5 = vshrl.u32 %v260_v4, 7  ;;  %v261_v7 = vand.u32 127, %v260_v4  ;;  %v271_v11 = vmul.f32 %v253_v10, %v252_v9  ;;  %p427_p2 = scmp.ne.s32.totalorder %s703_s16, 2 }
  0x75   : > { %258 = vrot.lane.b32.xlu0 %v425_v3, %s662_s9 }
  0x76   : > { %v268_v8 = vadd.s32 %v267_v6, %v266_v5  ;;  %vm262_vm2 = vcmp.eq.s32.totalorder %v261_v7, 0 }
  0x78   : > { %vm269_vm3 = vcmp.lt.s32.totalorder %v268_v8, 24 }
  0xe7   : > { %v259_v12 = vpop.permute.xlu0 %258 }
  0xe8   : > { %v263_v13 = vsel %vm262_vm2, 1.0, %v259_v12 }
  0xe9   : > { %v270_v14 = vsel %vm269_vm3, %v263_v13, 0.0 }
  0xea   : > { %289 = vadd.xlane.f32.xlu1 %v270_v14  ;;  %v272_v15 = vmul.f32 %v271_v11, %v270_v14 }
  0xec   : > { %v273_v16 = vsel %vm269_vm3, %v272_v15, 0.0 }
  0xed   : > { %275 = vadd.xlane.f32.xlu0 %v273_v16 }
 0x177   : > { %v290_v17 = vpop.xlane.xlu1 %289 }
 0x178   : > { %v291_v18 = vrot.slane %v290_v17, 4 }
 0x17a   : > { %v292_v19 = vadd.f32 %v291_v18, %v290_v17  ;;  %v276_v20 = vpop.xlane.xlu0 %275 }
 0x17b   : > { %v277_v21 = vrot.slane %v276_v20, 4 }
 0x17c   : > { %v293_v22 = vrot.slane %v292_v19, 2 }
 0x17d   : > { %v278_v23 = vadd.f32 %v277_v21, %v276_v20 }
 0x17e   : > { %v294_v24 = vadd.f32 %v293_v22, %v292_v19 }
 0x17f   : > { %v279_v25 = vrot.slane %v278_v23, 2 }
 0x180   : > { %v295_v27 = vrot.slane %v294_v24, 1 }
 0x181   : > { %v280_v26 = vadd.f32 %v279_v25, %v278_v23 }
 0x182   : > { %v296_v30 = vadd.f32 %v295_v27, %v294_v24 }
 0x183   : > { %v281_v28 = vrot.slane %v280_v26, 1 }
 0x185   : > { %v282_v29 = vadd.f32 %v281_v28, %v280_v26 }
 0x187   : > { %432 = vpush %v282_v29 }
 0x188   : > { %434 = vpush %v296_v30 }
 0x1b7   : > { %304 = sbr.rel (%p427_p2) target bundleno = 469 (0x1d5), region = 52 }
 0x1b8   : > { %s433_s29 = spop %432 }
 0x1b9   : > { %v284_v33 = vstv %s433_s29  ;;  %s435_s4 = spop %434 }
 0x1ba   : > { %v285_v34 = vadd.f32 %v284_v33, %v274_v31  ;;  %v298_v35 = vstv %s435_s4 }
 0x1bb   : > { %v299_v36 = vadd.f32 %v298_v35, %v288_v32 }
 0x1bc   : > { %287 = vst.msk [vmem:[#allocation2] sm:$0x1] %vm286_vm4, %v285_v34 }
 0x1bd   : > { %300 = vst.msk [vmem:[#allocation3] sm:$0x1] %vm286_vm4, %v299_v36 }
 0x1c3   : > { %v305_v38 = vld [vmem:[#allocation2] sm:$0x1] }
 0x1c4   : > { %v306_v37 = vld [vmem:[#allocation3] sm:$0x1] }
 0x1c5   : > { %495 = vrcp.f32 %v306_v37 }
 0x1cf   : > { %v496_v39 = vpop.eup %495 }
 0x1d0   : > { %v308_v40 = vmul.f32 %v496_v39, %v305_v38 }
 0x1d2   : > { %v309_v41 = vsub.f32 0.0, %v308_v40 }
 0x1d4   : > { %310 = vst.msk [vmem:[#allocation10] sm:$0x1] %vm286_vm4, %v309_v41 }
 0x1d5 PF: > { %p457_p0 = scmp.eq.s32.totalorder %s703_s16, 2  ;;  %s663_s12 = smov [#allocation10]  }
 0x1d6   : > { %s318_s18 = sshll.u32 %s663_s12, 4  ;;  %s319_s18 = int_to_ptr.vmem [resolvable:$true] %s318_s18 }
 0x1d7   : > { %s587_s19 = scalar_lea.vmem %s319_s18, 16  ;;  %s593_s26 = scalar_lea.vmem %s319_s18, 32 }
 0x1d8   : > { %p588_p3 = scmp.ne.s32.totalorder %s319_s18, %s587_s19  ;;  %p594_p5 = scmp.lt.s32.totalorder %s319_s18, %s319_s18 }
 0x1d9   : > { %p595_p6 = scmp.lt.s32.totalorder %s593_s26, %s587_s19 }
 0x1da   : > { %p589_p7 = pnand %p588_p3, %p457_p0 }
 0x1db   : > { %p596_p10 = por %p595_p6, %p594_p5 }
 0x1dc   : > { %p590_p9 = pneg %p589_p7 }
 0x1de   : > { %p597_p4 = pnand %p596_p10, %p590_p9 }
 0x1e0   : > { %600 = shalt.err (!%p597_p4)
}
 0x1e1   : > { %s601_s23 = scalar_lea.hbm %s902_s3, 16 }
 0x1e2   : > { %p602_p1 = scmp.ne.s32.totalorder %s902_s3, %s601_s23  ;;  %p607_p12 = scmp.lt.u32.totalorder %s601_s23, %s902_s3 }
 0x1e4   : > { %p603_p13 = pnand %p602_p1, %p457_p0 }
 0x1e6   : > { %p604_p11 = pneg %p603_p13 }
 0x1e8   : > { %p609_p8 = pnand %p607_p12, %p604_p11 }
 0x1ea   : > { %612 = shalt.err (!%p609_p8)
}
 0x1eb   : > { %443 = dma.vmem_to_hbm [thread:$0]  (%p457_p0), %s319_s18, 16, %s902_s3, [#allocation6]  }
 0x1ec   : > { %638 = dma.done.wait (%p457_p0), [#allocation6], 16  }
 0x1ed   : > { %640 = vsyncadd (%p457_p0), [#allocation6], 4294967280 }
 0x1ee PF: > { %p17_p2 = scmp.ge.s32.totalorder %s706_s17, 5   ;;  %s914_s12 = smov %s647_s13 }
 0x1ef   : > { %s915_s13 = smov %s651_s14  ;;  %s916_s14 = smov %s716_s20 }
 0x1f0   : > { %s917_s15 = smov %s706_s17  ;;  %19 = sbr.rel (!%p17_p2) target bundleno = 6 (0x6), region = 101 }
 0x1f7   :  { %331 = vsyncpa [#allocation5], 1 }
 0x1f8   :  { %333 = vsyncpa [#allocation5 + $0x1], 1 }
 0x1f9   :  { %334 = vsyncpa [#allocation8], 1 }
 0x1fa   :  { %336 = vsyncpa [#allocation8 + $0x1], 1 }
 0x1fb   :  { %337 = vsyncpa [#allocation6], 1 }
 0x1fc   :  { %339 = vsyncpa [#allocation6 + $0x1], 1 }

</bundles_post_ra>
